<compile_context>
chip_gen: v7x
topology: tpu7x:2x2x1
jax: 0.10.0
libtpu: 0.0.40
codegen_flags: <defaults>
</compile_context>

<pallas_src>
import functools

import jax
import jax.numpy as jnp
from jax.experimental import pallas as pl
from jax.experimental.pallas import tpu as pltpu


def _pick_tiles(B, C, HW, itemsize, target_block_bytes, max_lane_slices=32):
    """Pick (b_blk, hw_blk): batch tile and 128-multiple spatial tile."""
    if HW < 128:
        # Full spatial extent in one chunk (block dim == full array dim is legal).
        hw_blk = HW
    else:
        bytes_per_col = max(1, C * itemsize)
        budget_cols = max(128, (target_block_bytes // bytes_per_col) // 128 * 128)
        hw_cap = (HW // 128) * 128          # largest 128-multiple <= HW
        hw_blk = max(128, min(budget_cols, max_lane_slices * 128, hw_cap))

    # Batch tile: divisor of B within the VMEM budget, capped at B//2 when
    # B >= 2 so the "parallel" axis has >= 2 steps (both v7x TensorCores busy).
    blk_bytes = max(1, C * hw_blk * itemsize)
    b_budget = max(1, target_block_bytes // blk_bytes)
    b_cap = min(B, b_budget, max(1, B // 2)) if B >= 2 else 1

    plain = 1
    for d in range(b_cap, 0, -1):
        if B % d == 0:
            plain = d
            break
    mult8 = 0
    for d in range((b_cap // 8) * 8, 0, -8):
        if B % d == 0:
            mult8 = d
            break
    # Prefer a sublane-dense (multiple-of-8) batch tile unless it costs >2x size.
    b_blk = mult8 if (mult8 > 0 and 2 * mult8 >= plain) else plain
    return b_blk, hw_blk


def _channel_attention_kernel(x_ref, w1t_ref, w2t_ref, out_ref,
                              max_acc, sum_acc, *, hw, needs_mask):
    # x_ref   : (b_blk, C, hw_blk)   chunk of flattened activations
    # w1t_ref : (C, C_r)             first 1x1 conv weight, transposed
    # w2t_ref : (C_r, C)             second 1x1 conv weight, transposed
    # out_ref : (b_blk, 1, C)        sigmoid-ed channel attention
    # max_acc / sum_acc : (b_blk, C, lane) f32 lane-shaped pooling accumulators
    k = pl.program_id(1)
    hw_blk = x_ref.shape[2]
    lane = max_acc.shape[2]
    n_slices = hw_blk // lane

    @pl.when(k == 0)
    def _():
        max_acc[...] = jnp.full(max_acc.shape, -jnp.inf, max_acc.dtype)
        sum_acc[...] = jnp.zeros(sum_acc.shape, sum_acc.dtype)

    # Hot loop: pure VPU elementwise folds of 128-wide lane slices into the
    # lane-shaped accumulators (no cross-lane reduce, no block-sized f32 temp).
    base = k * hw_blk
    for s in range(n_slices):                 # static, offsets are free views
        xs = x_ref[:, :, pl.ds(s * lane, lane)].astype(jnp.float32)
        if needs_mask:
            col = base + s * lane + jax.lax.broadcasted_iota(
                jnp.int32, (1, 1, lane), 2)
            valid = col < hw
            x_max = jnp.where(valid, xs, -jnp.inf)
            x_sum = jnp.where(valid, xs, 0.0)
        else:
            x_max = xs
            x_sum = xs
        max_acc[...] = jnp.maximum(max_acc[...], x_max)
        sum_acc[...] = sum_acc[...] + x_sum

    # Epilogue (once per output tile): single cross-lane collapse + SE MLP.
    @pl.when(k == pl.num_programs(1) - 1)
    def _():
        max_p = jnp.max(max_acc[...], axis=2)                    # (b_blk, C)
        avg_p = jnp.sum(sum_acc[...], axis=2) * (1.0 / hw)       # (b_blk, C)
        w1t = w1t_ref[...]
        h = (jnp.maximum(jnp.dot(max_p, w1t,
                                 preferred_element_type=jnp.float32), 0.0)
             + jnp.maximum(jnp.dot(avg_p, w1t,
                                   preferred_element_type=jnp.float32), 0.0))
        # Second 1x1 conv is linear & bias-free, so se(max)+se(avg) folds into
        # a single matmul on the summed hidden activations.
        o = jnp.dot(h, w2t_ref[...], preferred_element_type=jnp.float32)
        att = jax.nn.sigmoid(o)                                  # (b_blk, C)
        out_ref[...] = att.reshape(out_ref.shape).astype(out_ref.dtype)


def channel_attention(x, w1, w2, *, target_block_bytes=4 * 1024 * 1024):
    """x: (B, C, H, W); w1: (C_r, C); w2: (C, C_r)  -> (B, C, 1, 1) f32."""
    B, C, H, W = x.shape
    HW = H * W
    C_r = w1.shape[0]

    x_flat = x.reshape(B, C, HW)
    w1_t = jnp.asarray(w1, jnp.float32).T     # (C, C_r)
    w2_t = jnp.asarray(w2, jnp.float32).T     # (C_r, C)

    b_blk, hw_blk = _pick_tiles(B, C, HW, x.dtype.itemsize, target_block_bytes)
    n_k = pl.cdiv(HW, hw_blk)
    needs_mask = (HW % hw_blk) != 0
    lane = min(128, hw_blk)
    grid = (B // b_blk, n_k)

    kernel = functools.partial(_channel_attention_kernel,
                               hw=HW, needs_mask=needs_mask)

    cost = pl.CostEstimate(
        flops=int(B * (2 * C * HW + 6 * C * C_r)),
        transcendentals=int(B * C),
        bytes_accessed=int(x_flat.size * x.dtype.itemsize
                           + (w1_t.size + w2_t.size) * 4
                           + B * C * 4),
    )

    out = pl.pallas_call(
        kernel,
        out_shape=jax.ShapeDtypeStruct((B, 1, C), jnp.float32),
        grid_spec=pltpu.PrefetchScalarGridSpec(
            num_scalar_prefetch=0,
            grid=grid,
            in_specs=[
                pl.BlockSpec((b_blk, C, hw_blk), lambda b, k: (b, 0, k)),
                pl.BlockSpec((C, C_r), lambda b, k: (0, 0)),
                pl.BlockSpec((C_r, C), lambda b, k: (0, 0)),
            ],
            out_specs=pl.BlockSpec((b_blk, 1, C), lambda b, k: (b, 0, 0)),
            scratch_shapes=[
                pltpu.VMEM((b_blk, C, lane), jnp.float32),   # running max (lanes)
                pltpu.VMEM((b_blk, C, lane), jnp.float32),   # running sum (lanes)
            ],
        ),
        compiler_params=pltpu.CompilerParams(
            dimension_semantics=("parallel", "arbitrary"),
        ),
        cost_estimate=cost,
    )(x_flat, w1_t, w2_t)

    return out.reshape(B, C, 1, 1)


def _reference(x, w1, w2):
    # Pure-JAX reference mirroring the PyTorch forward.
    max_p = jnp.max(x, axis=(2, 3))            # (B, C)
    avg_p = jnp.mean(x, axis=(2, 3))           # (B, C)

    def se(p):
        h = jnp.maximum(p @ w1.T, 0.0)         # (B, C_r)
        return h @ w2.T                        # (B, C)

    out = jax.nn.sigmoid(se(max_p) + se(avg_p))
    return out.reshape(*out.shape, 1, 1)


if __name__ == "__main__":
    key = jax.random.PRNGKey(0)
    kx, k1, k2, kx2 = jax.random.split(key, 4)

    B, C, H, W = 4, 32, 16, 16
    reduction = 16
    C_r = C // reduction

    x = jax.random.normal(kx, (B, C, H, W), dtype=jnp.float32)
    # Conv2d weights (C_out, C_in, 1, 1) with bias=False -> squeeze to matrices.
    w1 = jax.random.normal(k1, (C_r, C), dtype=jnp.float32) * 0.1
    w2 = jax.random.normal(k2, (C, C_r), dtype=jnp.float32) * 0.1

    out = jax.block_until_ready(channel_attention(x, w1, w2))
    ref = _reference(x, w1, w2)
    assert out.shape == (B, C, 1, 1)
    assert jnp.allclose(out, ref, atol=1e-5, rtol=1e-5)

    # Non-128-divisible spatial size (14x14 = 196) exercises the masked-tail path.
    x2 = jax.random.normal(kx2, (2, C, 14, 14), dtype=jnp.float32)
    out2 = jax.block_until_ready(channel_attention(x2, w1, w2))
    ref2 = _reference(x2, w1, w2)
    assert out2.shape == (2, C, 1, 1)
    assert jnp.allclose(out2, ref2, atol=1e-5, rtol=1e-5)

    print("KERNEL_OK")
</pallas_src>

<mosaic_0001>
module attributes {stable_mosaic.version = 11 : i64} {
  func.func @_channel_attention_kernel(%arg0: i32, %arg1: i32, %arg2: memref<2x32x256xf32, #tpu.memory_space<vmem>>, %arg3: memref<32x2xf32, #tpu.memory_space<vmem>>, %arg4: memref<2x32xf32, #tpu.memory_space<vmem>>, %arg5: memref<2x1x32xf32, #tpu.memory_space<vmem>>, %arg6: memref<2x32x128xf32, #tpu.memory_space<vmem>>, %arg7: memref<2x32x128xf32, #tpu.memory_space<vmem>>) attributes {dimension_semantics = [#tpu.dimension_semantics<parallel>, #tpu.dimension_semantics<arbitrary>], iteration_bounds = array<i64: 2, 1>, scalar_prefetch = 0 : i64, scratch_operands = 2 : i64, tpu.core_type = #tpu.core_type<tc>, window_params = [{transform_indices = @transform_0, window_bounds = array<i64: 2, 32, 256>}, {pipeline_mode = #tpu.pipeline_mode<synchronous>, transform_indices = @transform_1, window_bounds = array<i64: 32, 2>}, {pipeline_mode = #tpu.pipeline_mode<synchronous>, transform_indices = @transform_2, window_bounds = array<i64: 2, 32>}, {transform_indices = @transform_3, window_bounds = array<i64: 2, 1, 32>}]} {
    %c0_i32 = arith.constant 0 : i32
    %0 = arith.cmpi eq, %arg1, %c0_i32 : i32
    %1 = arith.extui %0 : i1 to i32
    %c0_i32_0 = arith.constant 0 : i32
    %2 = arith.cmpi ne, %1, %c0_i32_0 : i32
    scf.if %2 {
      %cst = arith.constant 0xFF800000 : f32
      %20 = vector.broadcast %cst : f32 to vector<2x32x128xf32>
      %c0_31 = arith.constant 0 : index
      %c0_32 = arith.constant 0 : index
      %c0_33 = arith.constant 0 : index
      %21 = vector.load %arg6[%c0_31, %c0_32, %c0_33] : memref<2x32x128xf32, #tpu.memory_space<vmem>>, vector<2x32x128xf32>
      tpu.vector_store %arg6[%c0_31, %c0_32, %c0_33], %20 {strides = array<i32>} : memref<2x32x128xf32, #tpu.memory_space<vmem>>, vector<2x32x128xf32>,
      %cst_34 = arith.constant 0.000000e+00 : f32
      %22 = vector.broadcast %cst_34 : f32 to vector<2x32x128xf32>
      %c0_35 = arith.constant 0 : index
      %c0_36 = arith.constant 0 : index
      %c0_37 = arith.constant 0 : index
      %23 = vector.load %arg7[%c0_35, %c0_36, %c0_37] : memref<2x32x128xf32, #tpu.memory_space<vmem>>, vector<2x32x128xf32>
      tpu.vector_store %arg7[%c0_35, %c0_36, %c0_37], %22 {strides = array<i32>} : memref<2x32x128xf32, #tpu.memory_space<vmem>>, vector<2x32x128xf32>,
    } else {
    }
    %c0 = arith.constant 0 : index
    %c0_1 = arith.constant 0 : index
    %c0_2 = arith.constant 0 : index
    %3 = vector.load %arg2[%c0, %c0_1, %c0_2] : memref<2x32x256xf32, #tpu.memory_space<vmem>>, vector<2x32x128xf32>
    %c0_3 = arith.constant 0 : index
    %c0_4 = arith.constant 0 : index
    %c0_5 = arith.constant 0 : index
    %4 = vector.load %arg6[%c0_3, %c0_4, %c0_5] : memref<2x32x128xf32, #tpu.memory_space<vmem>>, vector<2x32x128xf32>
    %5 = arith.maximumf %4, %3 : vector<2x32x128xf32>
    %c0_6 = arith.constant 0 : index
    %c0_7 = arith.constant 0 : index
    %c0_8 = arith.constant 0 : index
    %6 = vector.load %arg6[%c0_6, %c0_7, %c0_8] : memref<2x32x128xf32, #tpu.memory_space<vmem>>, vector<2x32x128xf32>
    tpu.vector_store %arg6[%c0_6, %c0_7, %c0_8], %5 {strides = array<i32>} : memref<2x32x128xf32, #tpu.memory_space<vmem>>, vector<2x32x128xf32>,
    %c0_9 = arith.constant 0 : index
    %c0_10 = arith.constant 0 : index
    %c0_11 = arith.constant 0 : index
    %7 = vector.load %arg7[%c0_9, %c0_10, %c0_11] : memref<2x32x128xf32, #tpu.memory_space<vmem>>, vector<2x32x128xf32>
    %8 = arith.addf %7, %3 : vector<2x32x128xf32>
    %c0_12 = arith.constant 0 : index
    %c0_13 = arith.constant 0 : index
    %c0_14 = arith.constant 0 : index
    %9 = vector.load %arg7[%c0_12, %c0_13, %c0_14] : memref<2x32x128xf32, #tpu.memory_space<vmem>>, vector<2x32x128xf32>
    tpu.vector_store %arg7[%c0_12, %c0_13, %c0_14], %8 {strides = array<i32>} : memref<2x32x128xf32, #tpu.memory_space<vmem>>, vector<2x32x128xf32>,
    %c0_15 = arith.constant 0 : index
    %c0_16 = arith.constant 0 : index
    %c128 = arith.constant 128 : index
    %10 = vector.load %arg2[%c0_15, %c0_16, %c128] : memref<2x32x256xf32, #tpu.memory_space<vmem>>, vector<2x32x128xf32>
    %c0_17 = arith.constant 0 : index
    %c0_18 = arith.constant 0 : index
    %c0_19 = arith.constant 0 : index
    %11 = vector.load %arg6[%c0_17, %c0_18, %c0_19] : memref<2x32x128xf32, #tpu.memory_space<vmem>>, vector<2x32x128xf32>
    %12 = arith.maximumf %11, %10 : vector<2x32x128xf32>
    %c0_20 = arith.constant 0 : index
    %c0_21 = arith.constant 0 : index
    %c0_22 = arith.constant 0 : index
    %13 = vector.load %arg6[%c0_20, %c0_21, %c0_22] : memref<2x32x128xf32, #tpu.memory_space<vmem>>, vector<2x32x128xf32>
    tpu.vector_store %arg6[%c0_20, %c0_21, %c0_22], %12 {strides = array<i32>} : memref<2x32x128xf32, #tpu.memory_space<vmem>>, vector<2x32x128xf32>,
    %c0_23 = arith.constant 0 : index
    %c0_24 = arith.constant 0 : index
    %c0_25 = arith.constant 0 : index
    %14 = vector.load %arg7[%c0_23, %c0_24, %c0_25] : memref<2x32x128xf32, #tpu.memory_space<vmem>>, vector<2x32x128xf32>
    %15 = arith.addf %14, %10 : vector<2x32x128xf32>
    %c0_26 = arith.constant 0 : index
    %c0_27 = arith.constant 0 : index
    %c0_28 = arith.constant 0 : index
    %16 = vector.load %arg7[%c0_26, %c0_27, %c0_28] : memref<2x32x128xf32, #tpu.memory_space<vmem>>, vector<2x32x128xf32>
    tpu.vector_store %arg7[%c0_26, %c0_27, %c0_28], %15 {strides = array<i32>} : memref<2x32x128xf32, #tpu.memory_space<vmem>>, vector<2x32x128xf32>,
    %c0_i32_29 = arith.constant 0 : i32
    %17 = arith.cmpi eq, %arg1, %c0_i32_29 : i32
    %18 = arith.extui %17 : i1 to i32
    %c0_i32_30 = arith.constant 0 : i32
    %19 = arith.cmpi ne, %18, %c0_i32_30 : i32
    scf.if %19 {
      %c0_31 = arith.constant 0 : index
      %c0_32 = arith.constant 0 : index
      %c0_33 = arith.constant 0 : index
      %20 = vector.load %arg6[%c0_31, %c0_32, %c0_33] : memref<2x32x128xf32, #tpu.memory_space<vmem>>, vector<2x32x128xf32>
      %cst = arith.constant dense<0xFF800000> : vector<2x32xf32>
      %21 = vector.multi_reduction <maximumf>, %20, %cst [2] : vector<2x32x128xf32> to vector<2x32xf32>
      %c0_34 = arith.constant 0 : index
      %c0_35 = arith.constant 0 : index
      %c0_36 = arith.constant 0 : index
      %22 = vector.load %arg7[%c0_34, %c0_35, %c0_36] : memref<2x32x128xf32, #tpu.memory_space<vmem>>, vector<2x32x128xf32>
      %cst_37 = arith.constant dense<0.000000e+00> : vector<2x32xf32>
      %23 = vector.multi_reduction <add>, %22, %cst_37 [2] : vector<2x32x128xf32> to vector<2x32xf32>
      %cst_38 = arith.constant 3.906250e-03 : f32
      %24 = vector.broadcast %cst_38 : f32 to vector<2x32xf32>
      %25 = arith.mulf %23, %24 : vector<2x32xf32>
      %c0_39 = arith.constant 0 : index
      %c0_40 = arith.constant 0 : index
      %26 = vector.load %arg3[%c0_39, %c0_40] : memref<32x2xf32, #tpu.memory_space<vmem>>, vector<32x2xf32>
      %cst_41 = arith.constant dense<0.000000e+00> : vector<2x2xf32>
      %27 = tpu.matmul %21, %26, %cst_41 {dimension_numbers = #tpu.dot_dimension_numbers<[1], [0], [0], [1], [0, 0, 1, 1], [], []>} : vector<2x32xf32>, vector<32x2xf32>, vector<2x2xf32> -> vector<2x2xf32>
      %cst_42 = arith.constant 0.000000e+00 : f32
      %28 = vector.broadcast %cst_42 : f32 to vector<2x2xf32>
      %29 = arith.maximumf %27, %28 : vector<2x2xf32>
      %cst_43 = arith.constant dense<0.000000e+00> : vector<2x2xf32>
      %30 = tpu.matmul %25, %26, %cst_43 {dimension_numbers = #tpu.dot_dimension_numbers<[1], [0], [0], [1], [0, 0, 1, 1], [], []>} : vector<2x32xf32>, vector<32x2xf32>, vector<2x2xf32> -> vector<2x2xf32>
      %cst_44 = arith.constant 0.000000e+00 : f32
      %31 = vector.broadcast %cst_44 : f32 to vector<2x2xf32>
      %32 = arith.maximumf %30, %31 : vector<2x2xf32>
      %33 = arith.addf %29, %32 : vector<2x2xf32>
      %c0_45 = arith.constant 0 : index
      %c0_46 = arith.constant 0 : index
      %34 = vector.load %arg4[%c0_45, %c0_46] : memref<2x32xf32, #tpu.memory_space<vmem>>, vector<2x32xf32>
      %cst_47 = arith.constant dense<0.000000e+00> : vector<2x32xf32>
      %35 = tpu.matmul %33, %34, %cst_47 {dimension_numbers = #tpu.dot_dimension_numbers<[1], [0], [0], [1], [0, 0, 1, 1], [], []>} : vector<2x2xf32>, vector<2x32xf32>, vector<2x32xf32> -> vector<2x32xf32>
      %36 = arith.negf %35 : vector<2x32xf32>
      %37 = math.exp %36 : vector<2x32xf32>
      %cst_48 = arith.constant 1.000000e+00 : f32
      %38 = vector.broadcast %cst_48 : f32 to vector<2x32xf32>
      %39 = arith.addf %38, %37 : vector<2x32xf32>
      %40 = arith.divf %38, %39 : vector<2x32xf32>
      %41 = vector.shape_cast %40 : vector<2x32xf32> to vector<2x1x32xf32>
      %c0_49 = arith.constant 0 : index
      %c0_50 = arith.constant 0 : index
      %c0_51 = arith.constant 0 : index
      %42 = vector.load %arg5[%c0_49, %c0_50, %c0_51] : memref<2x1x32xf32, #tpu.memory_space<vmem>>, vector<2x1x32xf32>
      tpu.vector_store %arg5[%c0_49, %c0_50, %c0_51], %41 {strides = array<i32>} : memref<2x1x32xf32, #tpu.memory_space<vmem>>, vector<2x1x32xf32>,
    } else {
    }
    return
  }
  func.func @transform_0(%arg0: i32, %arg1: i32) -> (i32, i32, i32) {
    %c0_i32 = arith.constant 0 : i32
    %c0_i32_0 = arith.constant 0 : i32
    return %arg0, %c0_i32, %arg1 : i32, i32, i32
  }
  func.func @transform_1(%arg0: i32, %arg1: i32) -> (i32, i32) {
    %c0_i32 = arith.constant 0 : i32
    %c0_i32_0 = arith.constant 0 : i32
    %c0_i32_1 = arith.constant 0 : i32
    return %c0_i32, %c0_i32_0 : i32, i32
  }
  func.func @transform_2(%arg0: i32, %arg1: i32) -> (i32, i32) {
    %c0_i32 = arith.constant 0 : i32
    %c0_i32_0 = arith.constant 0 : i32
    %c0_i32_1 = arith.constant 0 : i32
    return %c0_i32, %c0_i32_0 : i32, i32
  }
  func.func @transform_3(%arg0: i32, %arg1: i32) -> (i32, i32, i32) {
    %c0_i32 = arith.constant 0 : i32
    %c0_i32_0 = arith.constant 0 : i32
    %c0_i32_1 = arith.constant 0 : i32
    return %arg0, %c0_i32, %c0_i32_0 : i32, i32, i32
  }
}

</mosaic_0001>

<bundles_post_ra>
// kernel: tpu_custom_call.1
= control target key start
LH: loop header
LB: loop body
LE: loop exit
PB: predicated region body
PF: predicated region fallthrough
CT: control target
= control target key end

     0   :  { %8 = vsyncpa [#allocation5], 0  ;;  %s1398_s0 = inlined_call_operand.hbm [shape: f32[4,32,256], index: 0, kind: input, shape index: {}]   ;;  %s1399_s1 = inlined_call_operand.vmem [shape: f32[32,2], index: 1, kind: input, shape index: {}]   ;;  %s1400_s2 = inlined_call_operand.vmem [shape: f32[2,32], index: 2, kind: input, shape index: {}]   ;;  %s1401_s3 = inlined_call_operand.hbm [shape: f32[4,1,32], index: 3, kind: output, shape index: {}]  }
   0x1   :  { %10 = vsyncpa [#allocation5 + $0x1], 0 }
   0x2   :  { %11 = vsyncpa [#allocation6], 0 }
   0x3   :  { %13 = vsyncpa [#allocation6 + $0x1], 0  ;;  %s1159_s12 = smov 0   ;;  %s1161_s13 = smov 0  }
   0x4   :  { %s1163_s14 = smov 0   ;;  %s1165_s15 = smov 0  }
   0x5   :  { %s1167_s16 = smov 0   ;;  %s1169_s17 = smov 0  }
   0x6 LB: > { %s866_s18 = sadd.s32 4294967295, %s1127_s17   ;;  %s867_s19 = sadd.s32 4294967294, %s1127_s17   ;;  %s1127_s17 = sphi %s1169_s17, %s19_s17   ;;  %s1123_s16 = sphi %s1167_s16, %s1416_s16   ;;  %s1119_s15 = sphi %s1165_s15, %s1415_s15   ;;  %s1115_s14 = sphi %s1163_s14, %s1414_s14   ;;  %s1111_s13 = sphi %s1161_s13, %s1413_s13   ;;  %s1107_s12 = sphi %s1159_s12, %s1412_s12  }
   0x7   : > { %s31_s20 = sadd.s32 1, %s1123_s16  ;;  %s40_s21 = sadd.s32 1, %s1115_s14 }
   0x8   : > { %p33_p0 = scmp.ge.s32.totalorder %s31_s20, 2  ;;  %p47_p1 = scmp.ne.s32.totalorder %s1115_s14, %s1111_s13 }
   0x9   : > { %p48_p2 = scmp.eq.s32.totalorder %s1127_s17, 0  ;;  %p53_p3 = scmp.ne.s32.totalorder %s1111_s13, %s1107_s12 }
   0xa   : > { %s1418_s20 = smov (%p33_p0, %s31_s20), 0  ;;  %p54_p5 = scmp.eq.s32.totalorder %s866_s18, 0 }
   0xb   : > { %p1200_p4 = por %p48_p2, %p47_p1  ;;  %s35_s23 = ssub.s32 %s1123_s16, %s1418_s20 }
   0xc   : > { %p119_p6 = scmp.eq.s32.totalorder %s866_s18, 1  ;;  %p38_p7 = scmp.eq.s32.totalorder %s35_s23, 0 }
   0xd   : > { %p1206_p8 = por %p54_p5, %p53_p3  ;;  %p125_p10 = scmp.eq.s32.totalorder %s867_s19, 1 }
   0xe   : > { %p1210_p9 = por %p119_p6, %p47_p1  ;;  %p953_p13 = scmp.lt.s32.totalorder %s1127_s17, 2 }
   0xf   : > { %s1215_s26 = scalar_select %p38_p7, %s1115_s14, %s40_s21  }
  0x10   : > { %s1405_s25 = scalar_select %p1210_p9, 1, 0 }
  0x11   : > { %p1217_p11 = por %p125_p10, %p53_p3  ;;  %s151_s28 = sand.u32 1, %s1115_s14  }
  0x12   : > { %s870_s29 = sshll.u32 %s151_s28, 7  ;;  %s888_s30 = sshll.u32 %s1123_s16, 11 }
  0x13   : > { %s1406_s27 = scalar_select %p1217_p11, 1, 0 }
  0x14   : > { %s1228_s6 = scalar_lea.hbm %s1398_s0, %s888_s30  ;;  %s155_s7 = scalar_lea.vmem [#allocation4], %s870_s29 }
  0x15   : > { %s165_s8 = sshll.u32 %s155_s7, 4  ;;  %p1234_p0 = pnand %p953_p13, %p1200_p4  ;;  %s1230_s8 = int_to_ptr.vmem [resolvable:$true] %s165_s8 }
  0x16   : > { %s1239_s10 = scalar_lea.sflag [#allocation5], %s151_s28  ;;  %s1015_s11 = scalar_lea.hbm %s1228_s6, 2048 }
  0x17   : > { %p1016_p2 = scmp.ne.s32.totalorder %s1228_s6, %s1015_s11  ;;  %p1017_p3 = pneg %p1234_p0 }
  0x18   : > { %s1020_s21 = scalar_lea.hbm %s1398_s0, 4096  ;;  %p1021_p4 = scmp.lt.u32.totalorder %s1228_s6, %s1398_s0 }
  0x19   : > { %p1018_p5 = pnand %p1017_p3, %p1016_p2  ;;  %p1022_p7 = scmp.lt.u32.totalorder %s1020_s21, %s1015_s11 }
  0x1a   : > { %p1024_p13 = scmp.lt.u32.totalorder %s1015_s11, %s1228_s6 }
  0x1b   : > { %p1019_p6 = pneg %p1018_p5  ;;  %p1023_p10 = por %p1022_p7, %p1021_p4 }
  0x1d   : > { %p1025_p12 = por %p1024_p13, %p1023_p10 }
  0x1f   : > { %p1026_p1 = pnand %p1025_p12, %p1019_p6 }
  0x21   : > { %1029 = shalt.err (!%p1026_p1)
}
  0x22   : > { %s1030_s28 = scalar_lea.vmem %s1230_s8, 2048  ;;  %s1129_s29 = smov [#allocation4]  }
  0x23   : > { %p1031_p2 = scmp.ne.s32.totalorder %s1230_s8, %s1030_s28  ;;  %s1035_s30 = sshll.u32 %s1129_s29, 4  ;;  %s1036_s30 = int_to_ptr.vmem [resolvable:$false] %s1035_s30 }
  0x24   : > { %s1037_s4 = scalar_lea.vmem %s1036_s30, 4096  ;;  %p1038_p9 = scmp.lt.s32.totalorder %s1230_s8, %s1036_s30 }
  0x25   : > { %p1033_p5 = pnand %p1031_p2, %p1017_p3  ;;  %p1039_p4 = scmp.lt.s32.totalorder %s1037_s4, %s1030_s28 }
  0x27   : > { %p1034_p11 = pneg %p1033_p5  ;;  %p1040_p7 = por %p1039_p4, %p1038_p9 }
  0x29   : > { %p1041_p10 = pnand %p1040_p7, %p1034_p11 }
  0x2b   : > { %1044 = shalt.err (!%p1041_p10)
}
  0x2c   : > { %s1130_s5 = smov 256   ;;  %s1131_s7 = smov 16  }
  0x2d   : > { %948 = dma.hbm_to_vmem [thread:$0]  (!%p1234_p0), %s1228_s6, 2048, %s1230_s8, %s1239_s10, %s1130_s5, %s1130_s5, %s1131_s7  }
  0x2e   : > { %p173_p12 = scmp.lt.s32.totalorder %s1127_s17, 3  ;;  %p1408_p1 = scmp.ge.s32.totalorder %s1127_s17, 1 }
  0x30   : > { %p174_p3 = pnand %p1408_p1, %p173_p12 }
  0x31   : > { %s1271_s11 = sand.u32 (!%p174_p3), 1, %s1111_s13  }
  0x32   : > { %177 = sbr.rel (%p174_p3) target bundleno = 711 (0x2c7), region = 32  ;;  %s875_s18 = sshll.u32 (!%p174_p3), %s1271_s11, 7 }
  0x33   : > { %s180_s19 = scalar_lea.sflag (!%p174_p3), [#allocation5], %s1271_s11  ;;  %s1275_s21 = scalar_lea.vmem (!%p174_p3), [#allocation4], %s875_s18 }
  0x39   : > { %1098 = dma.done.wait (%p1206_p8), %s180_s19, 2048  }
  0x3a   : > { %1100 = vsyncadd (%p1206_p8), %s180_s19, 4294965248  ;;  %v233_v0 = vld [vmem:[%s1275_s21 + $0x40] sm:$0xff]  ;;  %v289_v1 = vld [vmem:[%s1275_s21 + $0x48] sm:$0xff]  ;;  %v1132_v35 = vmov 0.0|0.0   ;;  %vm1133_vm0 = vmmov 0   ;;  %v1134_v39 = vmov 0.0   ;;  %v412_v43 = vlaneseq }
  0x3b   : > { %v229_v2 = vld [vmem:[%s1275_s21] sm:$0xff]  ;;  %v329_v3 = vadd.f32 %v289_v1, %v233_v0  ;;  %v285_v4 = vld [vmem:[%s1275_s21 + $0x8] sm:$0xff]  ;;  %v234_v5 = vld [vmem:[%s1275_s21 + $0x50] sm:$0xff]  ;;  %v305_v21 = vmax.f32 %v233_v0, %v289_v1  ;;  %935 = vmatprep.subr.bf16.mxu1 %v1132_v35  ;;  %929 = vmatprep.subr.bf16.mxu0 %v1132_v35  ;;  %vm423_vm1 = vcmask 130112   ;;  %vm430_vm2 = vcmask 195712   ;;  %s876_s4 = sshll.u32 %s1271_s11, 1 }
  0x3c   : > { %v290_v6 = vld [vmem:[%s1275_s21 + $0x58] sm:$0xff]  ;;  %v325_v7 = vadd.f32 %v285_v4, %v229_v2  ;;  %v230_v8 = vld [vmem:[%s1275_s21 + $0x10] sm:$0xff]  ;;  %v235_v12 = vld [vmem:[%s1275_s21 + $0x60] sm:$0xff]  ;;  %v301_v19 = vmax.f32 %v229_v2, %v285_v4  ;;  %921 = vmatprep.mubr.msk.f32.mxu1 %vm1133_vm0, %v1134_v39  ;;  %910 = vmatprep.mubr.msk.f32.mxu0 %vm1133_vm0, %v1134_v39  ;;  %v413_v46 = vand.u32 127, %v412_v43  ;;  %v1314_v51 = vshrl.u32 %v412_v43, 7  ;;  %s889_s5 = sshll.u32 %s1119_s15, 5 }
  0x3d   : > { %v286_v9 = vld [vmem:[%s1275_s21 + $0x18] sm:$0xff]  ;;  %384 = vadd.xlane.f32.xlu1 %v329_v3  ;;  %v330_v10 = vadd.f32 %v290_v6, %v234_v5  ;;  %v291_v13 = vld [vmem:[%s1275_s21 + $0x68] sm:$0xff]  ;;  %v231_v14 = vld [vmem:[%s1275_s21 + $0x20] sm:$0xff]  ;;  %v306_v20 = vmax.f32 %v234_v5, %v290_v6  ;;  %vm437_vm3 = vcmask 261312   ;;  %vm458_vm4 = vcmask 1041409   ;;  %s205_s7 = scalar_lea.vmem [#allocation7], %s876_s4  ;;  %s1347_s24 = scalar_lea.hbm %s1401_s3, %s889_s5 }
  0x3e   : > { %376 = vadd.xlane.f32.xlu0 %v325_v7  ;;  %v326_v11 = vadd.f32 %v286_v9, %v230_v8  ;;  %v287_v15 = vld [vmem:[%s1275_s21 + $0x28] sm:$0xff]  ;;  %v331_v16 = vadd.f32 %v291_v13, %v235_v12  ;;  %v302_v18 = vmax.f32 %v230_v8, %v286_v9  ;;  %v236_v22 = vld [vmem:[%s1275_s21 + $0x70] sm:$0xff]  ;;  %v292_v23 = vld [vmem:[%s1275_s21 + $0x78] sm:$0xff]  ;;  %v307_v28 = vmax.f32 %v235_v12, %v291_v13  ;;  %s782_s18 = sshll.u32 %s205_s7, 4  ;;  %s769_s6 = scalar_lea.sflag [#allocation6], %s1271_s11  ;;  %s1349_s18 = int_to_ptr.vmem [resolvable:$true] %s782_s18 }
  0x3f   : > { %v327_v17 = vadd.f32 %v287_v15, %v231_v14  ;;  %v232_v24 = vld [vmem:[%s1275_s21 + $0x30] sm:$0xff]  ;;  %v288_v25 = vld [vmem:[%s1275_s21 + $0x38] sm:$0xff]  ;;  %v332_v26 = vadd.f32 %v292_v23, %v236_v22  ;;  %v303_v29 = vmax.f32 %v231_v14, %v287_v15  ;;  %v308_v30 = vmax.f32 %v236_v22, %v292_v23  ;;  %v400_v32 = vld [vmem:[%s1399_s1] sm:$0xff]  ;;  %s1045_s15 = scalar_lea.vmem %s1349_s18, 32  ;;  %p1409_p9 = scmp.ne.s32.totalorder %s1405_s25, 0 }
  0x40   : > { %v328_v27 = vadd.f32 %v288_v25, %v232_v24  ;;  %v304_v31 = vmax.f32 %v232_v24, %v288_v25  ;;  %v401_v33 = vld [vmem:[%s1399_s1 + $0x8] sm:$0xff]  ;;  %v402_v36 = vld [vmem:[%s1399_s1 + $0x10] sm:$0xff]  ;;  %v403_v37 = vld [vmem:[%s1399_s1 + $0x18] sm:$0xff]  ;;  %v418_v48 = vadd.s32 4294967288, %v413_v46  ;;  %v425_v49 = vadd.s32 4294967280, %v413_v46  ;;  %p1046_p8 = scmp.ne.s32.totalorder %s1349_s18, %s1045_s15  ;;  %s1136_s8 = smov [#allocation7]  }
  0x41   : > { %386 = vadd.xlane.f32.xlu1 %v330_v10  ;;  %v930_v34 = vpack.c.bf16 %v401_v33, %v400_v32  ;;  %v933_v38 = vpack.c.bf16 %v403_v37, %v402_v36  ;;  %v432_v55 = vadd.s32 4294967272, %v413_v46  ;;  %v416_v60 = vsub.s32 %v413_v46, %v1314_v51  ;;  %s1049_s9 = sshll.u32 %s1136_s8, 4  ;;  %s1050_s9 = int_to_ptr.vmem [resolvable:$false] %s1049_s9 }
  0x42   : > { %378 = vadd.xlane.f32.xlu0 %v326_v11  ;;  %v421_v53 = vsub.s32 %v418_v48, %v1314_v51  ;;  %v428_v57 = vsub.s32 %v425_v49, %v1314_v51  ;;  %vm460_vm5 = vcmask 261120   ;;  %vm660_vm6 = vcmask 1041408   ;;  %p1047_p11 = pnand %p1046_p8, %p1409_p9  ;;  %s1051_s10 = scalar_lea.vmem %s1050_s9, 64 }
  0x43   : > { %937 = vmatpush3.bf16.msra.mxu1 %v930_v34  ;;  %931 = vmatpush3.bf16.msra.mxu0 %v930_v34  ;;  %v435_v2 = vsub.s32 %v432_v55, %v1314_v51  ;;  %vm656_vm7 = vcmask 15360   ;;  %vm765_vm8 = vcmask 253952   ;;  %p1052_p6 = scmp.lt.s32.totalorder %s1349_s18, %s1050_s9  ;;  %p1053_p13 = scmp.lt.s32.totalorder %s1051_s10, %s1045_s15 }
  0x44   : > { %938 = vmatprep.subr.bf16.mxu1 %v1132_v35  ;;  %932 = vmatprep.subr.bf16.mxu0 %v1132_v35  ;;  %p1048_p0 = pneg %p1047_p11 }
  0x45   : > { %388 = vadd.xlane.f32.xlu1 %v331_v16  ;;  %p1054_p2 = por %p1053_p13, %p1052_p6 }
  0x46   : > { %380 = vadd.xlane.f32.xlu0 %v327_v17 }
  0x47   : > { %940 = vmatpush3.bf16.msra.mxu1 %v933_v38  ;;  %934 = vmatpush3.bf16.msra.mxu0 %v933_v38  ;;  %p1055_p5 = pnand %p1054_p2, %p1048_p0 }
  0x48   : > { %924 = vmatprep.subr.mxu0 %v1134_v39 }
  0x49   : > { %354 = vmax.xlane.f32.xlu1 %v302_v18 }
  0x4a   : > { %352 = vmax.xlane.f32.xlu0 %v301_v19 }
  0x4d   : > { %362 = vmax.xlane.f32.xlu1 %v306_v20 }
  0x4e   : > { %360 = vmax.xlane.f32.xlu0 %v305_v21 }
  0x51   : > { %390 = vadd.xlane.f32.xlu1 %v332_v26 }
  0x52   : > { %382 = vadd.xlane.f32.xlu0 %v328_v27 }
  0x55   : > { %364 = vmax.xlane.f32.xlu1 %v307_v28 }
  0x56   : > { %356 = vmax.xlane.f32.xlu0 %v303_v29 }
  0x59   : > { %366 = vmax.xlane.f32.xlu1 %v308_v30 }
  0x5a   : > { %358 = vmax.xlane.f32.xlu0 %v304_v31 }
  0xca   : > { %v385_v40 = vpop.xlane.xlu1 %384 }
  0xcb   : > { %v377_v41 = vpop.xlane.xlu0 %376  ;;  %v396_v61 = vmul.f32 0.00390625, %v385_v40 }
  0xcc   : > { %v392_v0 = vmul.f32 0.00390625, %v377_v41  ;;  %v655_v41 = vld [vmem:[%s1400_s2] sm:$0x3] }
  0xcd   : > { %v564_v6 = vrot.slane %v396_v61, %v416_v60 }
  0xce   : > { %v387_v42 = vpop.xlane.xlu1 %386  ;;  %v545_v10 = vrot.slane %v392_v0, %v416_v60 }
  0xcf   : > { %v379_v44 = vpop.xlane.xlu0 %378  ;;  %v397_v54 = vmul.f32 0.00390625, %v387_v42 }
  0xd0   : > { %v393_v56 = vmul.f32 0.00390625, %v379_v44 }
  0xd1   : > { %v568_v1 = vrot.slane %v397_v54, %v421_v53  ;;  %v1135_v54 = vmov 1966171168  }
  0xd2   : > { %v389_v45 = vpop.xlane.xlu1 %388  ;;  %v549_v3 = vrot.slane %v393_v56, %v421_v53  ;;  %v742_v55 = vunpack.c.l.s4 %v1135_v54 }
  0xd3   : > { %v381_v47 = vpop.xlane.xlu0 %380  ;;  %v398_v58 = vmul.f32 0.00390625, %v389_v45  ;;  %v569_v12 = vsel %vm423_vm1, %v568_v1, %v564_v6 }
  0xd4   : > { %v394_v62 = vmul.f32 0.00390625, %v381_v47  ;;  %v550_v14 = vsel %vm423_vm1, %v549_v3, %v545_v10  ;;  %v743_v56 = vunpack.c.0.s8 %v742_v55 }
  0xd5   : > { %v573_v4 = vrot.slane %v398_v58, %v428_v57 }
  0xd6   : > { %v355_v50 = vpop.xlane.xlu1 %354  ;;  %v554_v7 = vrot.slane %v394_v62, %v428_v57 }
  0xd7   : > { %v353_v52 = vpop.xlane.xlu0 %352  ;;  %v574_v15 = vsel %vm430_vm2, %v573_v4, %v569_v12  ;;  %v422_v23 = vrot.slane %v355_v50, %v421_v53 }
  0xd8   : > { %v555_v18 = vsel %vm430_vm2, %v554_v7, %v550_v14  ;;  %v417_v24 = vrot.slane %v353_v52, %v416_v60 }
  0xda   : > { %v363_v59 = vpop.xlane.xlu1 %362  ;;  %v424_v33 = vsel %vm423_vm1, %v422_v23, %v417_v24 }
  0xdb   : > { %v361_v63 = vpop.xlane.xlu0 %360  ;;  %v446_v19 = vrot.slane %v363_v59, %v421_v53 }
  0xdc   : > { %v442_v20 = vrot.slane %v361_v63, %v416_v60 }
  0xde   : > { %v391_v5 = vpop.xlane.xlu1 %390  ;;  %v447_v30 = vsel %vm423_vm1, %v446_v19, %v442_v20 }
  0xdf   : > { %v399_v8 = vmul.f32 0.00390625, %v391_v5  ;;  %v383_v9 = vpop.xlane.xlu0 %382 }
  0xe0   : > { %v395_v11 = vmul.f32 0.00390625, %v383_v9 }
  0xe1   : > { %v578_v13 = vrot.slane %v399_v8, %v435_v2 }
  0xe2   : > { %v559_v16 = vrot.slane %v395_v11, %v435_v2  ;;  %v365_v17 = vpop.xlane.xlu1 %364 }
  0xe3   : > { %v357_v21 = vpop.xlane.xlu0 %356  ;;  %v579_v22 = vsel %vm437_vm3, %v578_v13, %v574_v15  ;;  %v451_v25 = vrot.slane %v365_v17, %v428_v57 }
  0xe4   : > { %v560_v26 = vsel %vm437_vm3, %v559_v16, %v555_v18  ;;  %v429_v27 = vrot.slane %v357_v21, %v428_v57  ;;  %v746_v57 = vsub.s32 %v743_v56, %v1314_v51 }
  0xe5   : > { %v580_v28 = vsel %vm458_vm4, %v579_v22, %v560_v26  ;;  %v452_v34 = vsel %vm430_vm2, %v451_v25, %v447_v30 }
  0xe6   : > { %922 = vmatmul.mubr.msk.f32.vlgmr.msra.gmra.mrb[0].mxu1 %vm460_vm5, %v580_v28  ;;  %v367_v29 = vpop.xlane.xlu1 %366  ;;  %v431_v36 = vsel %vm430_vm2, %v429_v27, %v424_v33 }
  0xe7   : > { %v456_v31 = vrot.slane %v367_v29, %v435_v2  ;;  %v359_v32 = vpop.xlane.xlu0 %358 }
  0xe8   : > { %v436_v35 = vrot.slane %v359_v32, %v435_v2 }
  0xe9   : > { %v457_v37 = vsel %vm437_vm3, %v456_v31, %v452_v34 }
  0xea   : > { %v438_v38 = vsel %vm437_vm3, %v436_v35, %v431_v36 }
  0xeb   : > { %v459_v40 = vsel %vm458_vm4, %v457_v37, %v438_v38 }
  0xec   : > { %911 = vmatmul.mubr.msk.f32.vlgmr.msra.gmra.mrb[0].mxu0 %vm460_vm5, %v459_v40 }
  0xed   : > { %926 = vmatprep.mubr.msk.f32.mxu0 %vm1133_vm0, %v1134_v39  ;;  %925 = vmatpush3.msk.msra.mxu0 %vm660_vm6, %v655_v41 }
 0x1b9   : > { %v649_v42 = vpop.f32.mrb[0].mxu1 }
 0x1ba   : > { %v923_v43 = vpop.f32.mrb[1].mxu1  ;;  %v653_v45 = vmax.f32 %v649_v42, 0.0 }
 0x1bf   : > { %v529_v44 = vpop.f32.mrb[0].mxu0 }
 0x1c0   : > { %v533_v46 = vmax.f32 %v529_v44, 0.0  ;;  %v912_v47 = vpop.f32.mrb[1].mxu0 }
 0x1c2   : > { %v654_v48 = vadd.f32 %v653_v45, %v533_v46 }
 0x1c4   : > { %927 = vmatmul.mubr.msk.f32.vlgmr.msra.gmra.mrb[2].mxu0 %vm656_vm7, %v654_v48 }
 0x297   : > { %v730_v49 = vpop.f32.mrb[2].mxu0 }
 0x298   : > { %v881_v50 = vmul.f32 -1.442695, %v730_v49  ;;  %v928_v39 = vpop.f32.mrb[3].mxu0 }
 0x29a   : > { %1011 = vpow2.f32 %v881_v50 }
 0x2a4   : > { %v1012_v52 = vpop.eup %1011 }
 0x2a5   : > { %v737_v53 = vadd.f32 1.0, %v1012_v52 }
 0x2a7   : > { %1013 = vrcp.f32 %v737_v53 }
 0x2b1   : > { %v1014_v58 = vpop.eup %1013 }
 0x2b2   : > { %v747_v59 = vrot.slane %v1014_v58, %v746_v57 }
 0x2b4   : > { %v748_v60 = vcombine.high %v747_v59, %v747_v59  ;;  %v755_v61 = vrot.slane %v747_v59, %v746_v57 }
 0x2b6   : > { %v762_v51 = vrot.slane %v748_v60, %v746_v57  ;;  %766 = vst.msk [vmem:[%s205_s7] sm:$0x1] %vm765_vm8, %v755_v61 }
 0x2b8   : > { %767 = vst.msk [vmem:[%s205_s7 + $0x1] sm:$0x1] %vm765_vm8, %v762_v51 }
 0x2b9   : > { %1058 = shalt.err (!%p1055_p5)
}
 0x2ba   : > { %s1059_s22 = scalar_lea.hbm %s1347_s24, 32  ;;  %s1063_s29 = scalar_lea.hbm %s1401_s3, 64 }
 0x2bb   : > { %p1060_p4 = scmp.ne.s32.totalorder %s1347_s24, %s1059_s22  ;;  %p1064_p12 = scmp.lt.u32.totalorder %s1347_s24, %s1401_s3 }
 0x2bc   : > { %p1065_p1 = scmp.lt.u32.totalorder %s1063_s29, %s1059_s22  ;;  %p1067_p8 = scmp.lt.u32.totalorder %s1059_s22, %s1347_s24 }
 0x2bd   : > { %p1061_p7 = pnand %p1060_p4, %p1409_p9 }
 0x2be   : > { %p1066_p3 = por %p1065_p1, %p1064_p12 }
 0x2bf   : > { %p1062_p10 = pneg %p1061_p7 }
 0x2c0   : > { %p1068_p11 = por %p1067_p8, %p1066_p3 }
 0x2c2   : > { %p1069_p0 = pnand %p1068_p11, %p1062_p10 }
 0x2c4   : > { %1072 = shalt.err (!%p1069_p0)
}
 0x2c5   : > { %s1137_s5 = smov 16   ;;  %s1138_s7 = smov 1  }
 0x2c6   : > { %943 = dma.vmem_to_hbm [thread:$0]  (%p1409_p9), %s1349_s18, 32, %s1347_s24, %s769_s6, %s1137_s5, %s1137_s5, %s1138_s7  }
 0x2c7 PF: > { %s797_s19 = sand.u32 1, %s1107_s12   ;;  %p1410_p6 = scmp.ne.s32.totalorder %s1406_s27, 0 }
 0x2c8   : > { %p1411_p13 = scmp.ge.s32.totalorder %s1127_s17, 2  ;;  %s798_s21 = scalar_lea.sflag [#allocation6], %s797_s19 }
 0x2ca   : > { %p950_p2 = pnand %p1411_p13, %p1410_p6 }
 0x2cc   : > { %1102 = dma.done.wait (!%p950_p2), %s798_s21, 32  }
 0x2cd   : > { %1104 = vsyncadd (!%p950_p2), %s798_s21, 4294967264  ;;  %s19_s17 = sadd.s32 1, %s1127_s17   ;;  %s1412_s12 = smov %s1111_s13 }
 0x2ce   : > { %p16_p5 = scmp.ge.s32.totalorder %s19_s17, 4   ;;  %s1413_s13 = smov %s1115_s14 }
 0x2cf   : > { %s1414_s14 = smov %s1215_s26  ;;  %s1415_s15 = smov %s1123_s16 }
 0x2d0   : > { %s1416_s16 = smov %s1418_s20  ;;  %18 = sbr.rel (!%p16_p5) target bundleno = 6 (0x6), region = 85 }
 0x2d7   :  { %803 = vsyncpa [#allocation5], 1 }
 0x2d8   :  { %805 = vsyncpa [#allocation5 + $0x1], 1 }
 0x2d9   :  { %806 = vsyncpa [#allocation6], 1 }
 0x2da   :  { %808 = vsyncpa [#allocation6 + $0x1], 1 }

</bundles_post_ra>
